<compile_context>
chip_gen: v7x
topology: tpu7x:2x2x1
jax: 0.10.0
libtpu: 0.0.40
codegen_flags: <defaults>
</compile_context>

<pallas_src>
import jax
import jax.numpy as jnp
from jax.experimental import pallas as pl
from jax.experimental.pallas import tpu as pltpu


def _linear_interp_matrix(out_len: int, in_len: int) -> jnp.ndarray:
    """(out_len, in_len) matrix reproducing F.interpolate(mode='linear',
    align_corners=False) along the sequence axis."""
    i = jnp.arange(out_len, dtype=jnp.float32)
    src = (i + 0.5) * (in_len / out_len) - 0.5
    src = jnp.maximum(src, 0.0)                      # PyTorch clamps negative src to 0
    i0 = jnp.minimum(jnp.floor(src).astype(jnp.int32), in_len - 1)
    i1 = jnp.minimum(i0 + 1, in_len - 1)
    lam = src - i0.astype(jnp.float32)
    w = jnp.zeros((out_len, in_len), dtype=jnp.float32)
    rows = jnp.arange(out_len)
    w = w.at[rows, i0].add(1.0 - lam)
    w = w.at[rows, i1].add(lam)
    return w


def _add_kernel(x_ref, emb_ref, o_ref):
    # x_ref / emb_ref / o_ref: (1, Bt, S*D).  Scale already folded into emb,
    # dtypes already matched in the wrapper -> single fused VPU add.
    o_ref[...] = x_ref[...] + emb_ref[...]


def _pick_batch_tile(B: int, wh: int, row_bytes: int,
                     target_block_bytes: int = 2 << 20) -> int:
    """Largest multiple of wh that divides B with block size <= target.
    ~2 MiB per x block keeps (2x x-in + 2x out + 2x emb) well under the
    scoped-VMEM default on all of v5e / v6e / v7x."""
    best = wh
    bt = wh
    while bt <= B:
        if B % bt == 0 and bt * row_bytes <= target_block_bytes:
            best = bt
        bt += wh
    return best


def motion_embedding_forward(x, embed, *, scale=1.0, trained_length=-1):
    """JAX/Pallas equivalent of MotionEmbedding.forward.

    x:     (B, S, D)
    embed: (wh, max_seq_length, D) parameter
    """
    B, S, D = x.shape
    wh, max_seq, De = embed.shape
    assert De == D and S <= max_seq and B % wh == 0

    # --- Hoisted resampling (tiny: wh * S * D elements) -------------------
    if trained_length != -1 and S != trained_length:
        if trained_length > max_seq or trained_length <= 0:
            raise ValueError("Trained length is out of bounds")
        L = trained_length
        w = _linear_interp_matrix(S, L)                              # (S, L)
        emb = jnp.einsum("sl,wld->wsd", w, embed[:, :L, :].astype(jnp.float32))
    else:
        emb = embed[:, :S, :].astype(jnp.float32)                    # (wh, S, D)

    # Fold scale, match x's dtype so the kernel is a plain add.
    emb = (emb * jnp.float32(scale)).astype(x.dtype)                 # (wh, S, D)

    # --- Batch tiling / lane-dense layout ---------------------------------
    SD = S * D
    row_bytes = SD * jnp.dtype(x.dtype).itemsize
    Bt = _pick_batch_tile(B, wh, row_bytes)
    nb = B // Bt

    # x[g*Bt + j] needs emb[(g*Bt + j) % wh] == emb[j % wh] since Bt % wh == 0,
    # so a single pre-tiled (1, Bt, S*D) embed block is reused for every step.
    emb_tiled = jnp.tile(emb, (Bt // wh, 1, 1)).reshape(1, Bt, SD)
    x2 = x.reshape(nb, Bt, SD)

    out = pl.pallas_call(
        _add_kernel,
        out_shape=jax.ShapeDtypeStruct((nb, Bt, SD), x.dtype),
        grid_spec=pltpu.PrefetchScalarGridSpec(
            num_scalar_prefetch=0,
            grid=(nb,),
            in_specs=[
                pl.BlockSpec((1, Bt, SD), lambda g: (g, 0, 0)),   # x tile
                pl.BlockSpec((1, Bt, SD), lambda g: (0, 0, 0)),   # resident embed
            ],
            out_specs=pl.BlockSpec((1, Bt, SD), lambda g: (g, 0, 0)),
        ),
        compiler_params=pltpu.CompilerParams(
            dimension_semantics=("parallel",),      # independent rows -> both TCs on v7x
            vmem_limit_bytes=32 * 1024 * 1024,
        ),
        input_output_aliases={0: 0},                # semantically in-place add
    )(x2, emb_tiled)

    return out.reshape(B, S, D)


def motion_embedding_reference(x, embed, *, scale=1.0, trained_length=-1):
    """Pure-jnp reference (same math, no Pallas) for validation."""
    B, S, D = x.shape
    wh = embed.shape[0]
    if trained_length != -1 and S != trained_length:
        L = trained_length
        w = _linear_interp_matrix(S, L)
        emb = jnp.einsum("sl,wld->wsd", w, embed[:, :L, :])
    else:
        emb = embed[:, :S, :]
    emb = jnp.tile(emb, (B // wh, 1, 1))
    return x + emb * scale


if __name__ == "__main__":
    # Small, deterministic example shapes consistent with the module.
    B, S, D = 4, 8, 32            # batch, seq_length, embed_dim
    wh, max_seq = 2, 32           # spatial replicas, max_seq_length
    scale = 1.5
    trained_length = 16           # != S -> exercises the linear-interp path

    key = jax.random.PRNGKey(0)
    kx, ke, ke2 = jax.random.split(key, 3)
    x = jax.random.normal(kx, (B, S, D), dtype=jnp.float32)
    # nn.Parameter(torch.zeros(...)) in the module; use deterministic random
    # values here so the add is non-trivial.
    embed = jax.random.normal(ke, (wh, max_seq, D), dtype=jnp.float32) * 0.02

    # Interpolation path (trained_length set, != seq).
    ref_interp = motion_embedding_reference(
        x, embed, scale=scale, trained_length=trained_length
    )
    out_interp = jax.block_until_ready(
        motion_embedding_forward(x, embed, scale=scale, trained_length=trained_length)
    )
    assert jnp.allclose(out_interp, ref_interp, atol=1e-5, rtol=1e-5)

    # Default path (trained_length = -1 -> plain slice + scaled add, no matmul).
    ref_plain = motion_embedding_reference(x, embed, scale=scale, trained_length=-1)
    out_plain = jax.block_until_ready(
        motion_embedding_forward(x, embed, scale=scale, trained_length=-1)
    )
    assert jnp.allclose(out_plain, ref_plain, atol=1e-5, rtol=1e-5)

    # B == wh path (no repeat in the PyTorch module).
    embed_full = jax.random.normal(ke2, (B, max_seq, D), dtype=jnp.float32) * 0.02
    ref_eq = motion_embedding_reference(x, embed_full, scale=scale, trained_length=-1)
    out_eq = jax.block_until_ready(
        motion_embedding_forward(x, embed_full, scale=scale, trained_length=-1)
    )
    assert jnp.allclose(out_eq, ref_eq, atol=1e-5, rtol=1e-5)

    print("KERNEL_OK")
</pallas_src>

<mosaic_0001>
module attributes {stable_mosaic.version = 11 : i64} {
  func.func @_add_kernel(%arg0: i32, %arg1: memref<1x4x256xf32, #tpu.memory_space<vmem>>, %arg2: memref<1x4x256xf32, #tpu.memory_space<vmem>>, %arg3: memref<1x4x256xf32, #tpu.memory_space<vmem>>) attributes {dimension_semantics = [#tpu.dimension_semantics<parallel>], iteration_bounds = array<i64: 1>, scalar_prefetch = 0 : i64, scratch_operands = 0 : i64, tpu.core_type = #tpu.core_type<tc>, window_params = [{transform_indices = @transform_0, window_bounds = array<i64: 1, 4, 256>}, {pipeline_mode = #tpu.pipeline_mode<synchronous>, transform_indices = @transform_1, window_bounds = array<i64: 1, 4, 256>}, {transform_indices = @transform_2, window_bounds = array<i64: 1, 4, 256>}]} {
    %c0 = arith.constant 0 : index
    %c0_0 = arith.constant 0 : index
    %c0_1 = arith.constant 0 : index
    %0 = vector.load %arg1[%c0, %c0_0, %c0_1] : memref<1x4x256xf32, #tpu.memory_space<vmem>>, vector<1x4x256xf32>
    %c0_2 = arith.constant 0 : index
    %c0_3 = arith.constant 0 : index
    %c0_4 = arith.constant 0 : index
    %1 = vector.load %arg2[%c0_2, %c0_3, %c0_4] : memref<1x4x256xf32, #tpu.memory_space<vmem>>, vector<1x4x256xf32>
    %2 = arith.addf %0, %1 : vector<1x4x256xf32>
    %c0_5 = arith.constant 0 : index
    %c0_6 = arith.constant 0 : index
    %c0_7 = arith.constant 0 : index
    %3 = vector.load %arg3[%c0_5, %c0_6, %c0_7] : memref<1x4x256xf32, #tpu.memory_space<vmem>>, vector<1x4x256xf32>
    tpu.vector_store %arg3[%c0_5, %c0_6, %c0_7], %2 {strides = array<i32>} : memref<1x4x256xf32, #tpu.memory_space<vmem>>, vector<1x4x256xf32>,
    return
  }
  func.func @transform_0(%arg0: i32) -> (i32, i32, i32) {
    %c0_i32 = arith.constant 0 : i32
    %c0_i32_0 = arith.constant 0 : i32
    %c0_i32_1 = arith.constant 0 : i32
    return %arg0, %c0_i32, %c0_i32_0 : i32, i32, i32
  }
  func.func @transform_1(%arg0: i32) -> (i32, i32, i32) {
    %c0_i32 = arith.constant 0 : i32
    %c0_i32_0 = arith.constant 0 : i32
    %c0_i32_1 = arith.constant 0 : i32
    %c0_i32_2 = arith.constant 0 : i32
    return %c0_i32, %c0_i32_0, %c0_i32_1 : i32, i32, i32
  }
  func.func @transform_2(%arg0: i32) -> (i32, i32, i32) {
    %c0_i32 = arith.constant 0 : i32
    %c0_i32_0 = arith.constant 0 : i32
    %c0_i32_1 = arith.constant 0 : i32
    return %arg0, %c0_i32, %c0_i32_0 : i32, i32, i32
  }
}

</mosaic_0001>

<bundles_post_ra>
// kernel: tpu_custom_call.1
= control target key start
LH: loop header
LB: loop body
LE: loop exit
PB: predicated region body
PF: predicated region fallthrough
CT: control target
= control target key end

     0   :  { %7 = vsyncpa [#allocation3], 0  ;;  %s137_s0 = inlined_call_operand.hbm [shape: f32[1,4,256], index: 0, kind: input, shape index: {}, may-alias: {0,2}]   ;;  %s138_s1 = inlined_call_operand.vmem [shape: f32[1,4,256], index: 1, kind: input, shape index: {}]   ;;  %s139_s2 = inlined_call_operand.hbm [shape: f32[1,4,256], index: 2, kind: output, shape index: {}, may-alias: {0,2}]  }
   0x1   :  { %8 = vsyncpa [#allocation4], 0  ;;  %s93_s9 = smov [#allocation2]   ;;  %s45_s13 = scalar_lea.hbm %s137_s0, 128 }
   0x2   :  { %s15_s10 = sshll.u32 %s93_s9, 4  ;;  %p46_p0 = scmp.ne.s32.totalorder %s137_s0, %s45_s13  ;;  %s16_s10 = int_to_ptr.vmem [resolvable:$true] %s15_s10 }
   0x3   :  { %p49_p1 = scmp.lt.u32.totalorder %s45_s13, %s137_s0 }
   0x5   :  { %p51_p2 = pnand %p49_p1, %p46_p0 }
   0x7   :  { %54 = shalt.err (!%p51_p2)
}
   0x8   :  { %s55_s18 = scalar_lea.vmem %s16_s10, 128  ;;  %p60_p4 = scmp.lt.s32.totalorder %s16_s10, %s16_s10 }
   0x9   :  { %p56_p3 = scmp.ne.s32.totalorder %s16_s10, %s55_s18  ;;  %p61_p5 = scmp.lt.s32.totalorder %s55_s18, %s55_s18 }
   0xb   :  { %p62_p6 = por %p61_p5, %p60_p4 }
   0xd   :  { %p63_p7 = pnand %p62_p6, %p56_p3 }
   0xf   :  { %66 = shalt.err (!%p63_p7)
}
  0x10   :  { %18 = dma.hbm_to_vmem [thread:$0]  %s137_s0, 128, %s16_s10, [#allocation3]  }
  0x11   :  { %89 = dma.done.wait [#allocation3], 128  }
  0x12   :  { %90 = vsyncadd [#allocation3], 4294967168  ;;  %s94_s21 = smov [#allocation5]   ;;  %v24_v0 = vld [vmem:[#allocation2] sm:$0xff] }
  0x13   :  { %s34_s22 = sshll.u32 %s94_s21, 4  ;;  %v25_v1 = vld [vmem:[%s138_s1] sm:$0xff]  ;;  %s35_s22 = int_to_ptr.vmem [resolvable:$true] %s34_s22 }
  0x14   :  { %v26_v2 = vadd.f32 %v25_v1, %v24_v0  ;;  %s67_s25 = scalar_lea.vmem %s35_s22, 128  ;;  %p72_p9 = scmp.lt.s32.totalorder %s35_s22, %s35_s22 }
  0x15   :  { %p68_p8 = scmp.ne.s32.totalorder %s35_s22, %s67_s25  ;;  %p73_p10 = scmp.lt.s32.totalorder %s67_s25, %s67_s25 }
  0x16   :  { %27 = vst [vmem:[#allocation5] sm:$0xff] %v26_v2 }
  0x17   :  { %p74_p11 = por %p73_p10, %p72_p9 }
  0x19   :  { %p75_p12 = pnand %p74_p11, %p68_p8 }
  0x1b   :  { %78 = shalt.err (!%p75_p12)
}
  0x1c   :  { %s79_s27 = scalar_lea.hbm %s139_s2, 128 }
  0x1d   :  { %p80_p13 = scmp.ne.s32.totalorder %s139_s2, %s79_s27  ;;  %p83_p0 = scmp.lt.u32.totalorder %s79_s27, %s139_s2 }
  0x1f   :  { %p85_p1 = pnand %p83_p0, %p80_p13 }
  0x21   :  { %88 = shalt.err (!%p85_p1)
}
  0x22   :  { %37 = dma.vmem_to_hbm [thread:$0]  %s35_s22, 128, %s139_s2, [#allocation4]  }
  0x23   :  { %91 = dma.done.wait [#allocation4], 128  }
  0x24   :  { %92 = vsyncadd [#allocation4], 4294967168 }
  0x25   :  { %41 = vsyncpa [#allocation3], 1 }
  0x26   :  { %42 = vsyncpa [#allocation4], 1 }

</bundles_post_ra>
